<compile_context>
chip_gen: v7x
topology: tpu7x:2x2x1
jax: 0.10.0
libtpu: 0.0.40
codegen_flags: <defaults>
</compile_context>

<pallas_src>
import numpy as np

import jax
import jax.numpy as jnp
from jax.experimental import pallas as pl
from jax.experimental.pallas import tpu as pltpu

EPS = 1e-5


# ------------------------------ small helpers ------------------------------ #

def _full_spec(shape):
    nd = len(shape)
    return pl.BlockSpec(shape, lambda *_: (0,) * nd)


_ROLL_SIGN_CACHE = []


def _roll_sign():
    """+1 if pltpu.roll follows jnp.roll's convention (out[i] = x[i - shift]), else -1.

    Probed once on device (outside any jit trace) so the conv tap shifts are
    correct regardless of the rotate direction the primitive lowers to.
    """
    if not _ROLL_SIGN_CACHE:
        def k(x_ref, o_ref):
            o_ref[...] = pltpu.roll(x_ref[...], 1, axis=0)

        x = jnp.broadcast_to(jnp.arange(8, dtype=jnp.float32)[:, None], (8, 128))
        out = pl.pallas_call(
            k,
            out_shape=jax.ShapeDtypeStruct((8, 128), jnp.float32),
            in_specs=[_full_spec((8, 128))],
            out_specs=_full_spec((8, 128)),
        )(x)
        _ROLL_SIGN_CACHE.append(1 if float(out[0, 0]) == 7.0 else -1)
    return _ROLL_SIGN_CACHE[0]


def _row_shift(x, d):
    """out[r] = x[(r + d) % M] along axis 0 (wrapped rows are masked by the caller)."""
    m = x.shape[0]
    return pltpu.roll(x, (-d * _roll_sign()) % m, axis=0)


def _taps_for(h, w):
    """(dy, dx) taps of a padded 3x3 conv that can ever contribute at (H, W)."""
    return [(dy, dx)
            for dy in (-1, 0, 1) if not (h == 1 and dy != 0)
            for dx in (-1, 0, 1) if not (w == 1 and dx != 0)]


class _MaskCache:
    """Zero-padding boundary masks per resolution, built once per kernel trace and
    shared by every conv at that resolution (avoids re-emitting broadcast iotas)."""

    def __init__(self):
        self._c = {}

    def get(self, n, h, w):
        key = (n, h, w)
        if key not in self._c:
            m = n * h * w
            r = jax.lax.broadcasted_iota(jnp.int32, (m, 1), 0)
            h_idx = (r // w) % h
            w_idx = r % w
            masks = {}
            for dy, dx in _taps_for(h, w):
                if dy == 0 and dx == 0:
                    masks[(dy, dx)] = None
                    continue
                conds = []
                if dy == -1:
                    conds.append(h_idx >= 1)
                elif dy == 1:
                    conds.append(h_idx <= h - 2)
                if dx == -1:
                    conds.append(w_idx >= 1)
                elif dx == 1:
                    conds.append(w_idx <= w - 2)
                ok = conds[0]
                for c in conds[1:]:
                    ok = jnp.logical_and(ok, c)
                masks[(dy, dx)] = ok
            self._c[key] = masks
        return self._c[key]


# --------------------------- in-kernel building blocks ---------------------- #

def _conv3x3_acc(inputs, n, h, w, mc):
    """Padded 3x3 conv on flat (M, Cin) slabs via shifted matmuls.

    inputs: list of (x (M, Cin) f32 value, w_ref (T, Cin, Cout) bf16 ref).
    Multiple pairs are accumulated (== conv over channel-concatenated inputs).
    Returns the f32 (M, Cout) pre-BN accumulator.
    """
    taps = _taps_for(h, w)
    masks = mc.get(n, h, w)
    acc = None
    for x, w_ref in inputs:
        for t, (dy, dx) in enumerate(taps):
            if dy == 0 and dx == 0:
                xs = x
            else:
                xs = _row_shift(x, dy * w + dx)
                xs = jnp.where(masks[(dy, dx)], xs, 0.0)
            part = jnp.dot(xs.astype(jnp.bfloat16), w_ref[t],
                           preferred_element_type=jnp.float32)
            acc = part if acc is None else acc + part
    return acc


def _bn_relu(acc, gb_ref):
    """Train-mode BatchNorm (biased var, eps=1e-5) + affine + ReLU on (M, C) f32.

    gb_ref is a (2, C) f32 ref: row 0 = gamma, row 1 = beta.
    """
    mean = jnp.mean(acc, axis=0, keepdims=True)
    var = jnp.maximum(jnp.mean(acc * acc, axis=0, keepdims=True) - mean * mean, 0.0)
    y = (acc - mean) * jax.lax.rsqrt(var + EPS)
    return jnp.maximum(y * gb_ref[0:1, :] + gb_ref[1:2, :], 0.0)


# ------------------------------- parameters --------------------------------- #

def _init_conv_bn(key, cin, cout):
    k1, k2, k3, k4 = jax.random.split(key, 4)
    w = 0.1 * jax.random.normal(k1, (cout, cin, 3, 3), jnp.float32)
    cb = 0.1 * jax.random.normal(k2, (cout,), jnp.float32)
    gamma = 1.0 + 0.1 * jax.random.normal(k3, (cout,), jnp.float32)
    beta = 0.1 * jax.random.normal(k4, (cout,), jnp.float32)
    return (w, cb, gamma, beta)


def init_codeunet(key, depth=4, code_size=2, n_classes=1, in_ch=3):
    """PyTorch-layout parameters (same structure as the reference module)."""
    c = [16, 32, 64, 128, 256, 512, 1024, 2048][:depth + 1]
    keys = iter(jax.random.split(key, 64))
    params = {}
    params["conv1"] = [_init_conv_bn(next(keys), in_ch, c[0]),
                       _init_conv_bn(next(keys), c[0], c[0])]
    params["encoders"] = [[_init_conv_bn(next(keys), c[i], c[i + 1]),
                           _init_conv_bn(next(keys), c[i + 1], c[i + 1])]
                          for i in range(depth)]
    params["code_convs"] = [[_init_conv_bn(next(keys), c[-1], c[-1]),
                             _init_conv_bn(next(keys), c[-1], c[-1])]
                            for _ in range(code_size)]
    decoders = []
    for i in reversed(range(depth)):
        ci, co = c[i + 1], c[i]
        ku1, ku2 = jax.random.split(next(keys))
        decoders.append({
            "up_w": 0.1 * jax.random.normal(ku1, (ci, co, 2, 2), jnp.float32),
            "up_b": 0.1 * jax.random.normal(ku2, (co,), jnp.float32),
            "conv1": _init_conv_bn(next(keys), ci, co),
            "conv2": _init_conv_bn(next(keys), co, co),
        })
    params["decoders"] = decoders
    kw, kb = jax.random.split(next(keys))
    params["out_w"] = 0.1 * jax.random.normal(kw, (n_classes, c[0], 3, 3), jnp.float32)
    params["out_b"] = 0.1 * jax.random.normal(kb, (n_classes,), jnp.float32)
    return params


def _prep_conv_bn(p, h, w):
    # conv bias is dropped on purpose: it is exactly cancelled by the train-mode
    # BatchNorm mean subtraction (the forward output is unchanged).
    wt, _cb, gamma, beta = p
    cout, cin = wt.shape[0], wt.shape[1]
    wk = jnp.transpose(wt, (2, 3, 1, 0)).reshape(9, cin, cout)
    idx = jnp.array([(dy + 1) * 3 + (dx + 1) for dy, dx in _taps_for(h, w)],
                    dtype=jnp.int32)
    wk = jnp.take(wk, idx, axis=0)                     # keep only reachable taps
    gb = jnp.stack([gamma, beta], axis=0).astype(jnp.float32)   # (2, cout)
    return wk.astype(jnp.bfloat16), gb


def _pool_gather(n, h, w):
    """0/1 matrices G[k] (M/4, M): G[k] @ x gathers the k-th pixel of each 2x2 window."""
    h2, w2 = h // 2, w // 2
    mo, mi = n * h2 * w2, n * h * w
    g = np.zeros((4, mo, mi), np.float32)
    for b in range(n):
        for ho in range(h2):
            for wo in range(w2):
                ro = (b * h2 + ho) * w2 + wo
                for a in range(2):
                    for c in range(2):
                        ri = (b * h + 2 * ho + a) * w + 2 * wo + c
                        g[a * 2 + c, ro, ri] = 1.0
    return jnp.asarray(g, jnp.bfloat16)


def _up_scatter(n, h, w):
    """0/1 matrices S[k] (4M, M): S[k] @ y scatters y to sub-pixel position k."""
    h2, w2 = 2 * h, 2 * w
    mo, mi = n * h2 * w2, n * h * w
    s = np.zeros((4, mo, mi), np.float32)
    for b in range(n):
        for hi in range(h):
            for wi in range(w):
                ri = (b * h + hi) * w + wi
                for ky in range(2):
                    for kx in range(2):
                        ro = (b * h2 + 2 * hi + ky) * w2 + 2 * wi + kx
                        s[ky * 2 + kx, ro, ri] = 1.0
    return jnp.asarray(s, jnp.bfloat16)


def prepare_params(params, n, h, w):
    """One-time re-layout of the PyTorch-style parameters for the fused kernel."""
    _roll_sign()                       # resolve the roll convention outside any jit
    depth = len(params["encoders"])
    assert h % (1 << depth) == 0 and w % (1 << depth) == 0
    hs = [h >> i for i in range(depth + 1)]
    ws = [w >> i for i in range(depth + 1)]

    prep = {}
    prep["stem"] = [_prep_conv_bn(p, hs[0], ws[0]) for p in params["conv1"]]
    prep["encoders"] = []
    for i, enc in enumerate(params["encoders"]):
        prep["encoders"].append({
            "G": _pool_gather(n, hs[i], ws[i]),
            "convs": [_prep_conv_bn(p, hs[i + 1], ws[i + 1]) for p in enc],
        })
    prep["code"] = [_prep_conv_bn(p, hs[depth], ws[depth])
                    for blk in params["code_convs"] for p in blk]
    prep["decoders"] = []
    for j, dec in enumerate(params["decoders"]):
        lvl = depth - 1 - j            # decoder j upsamples from level lvl+1 to lvl
        ci, co = dec["up_w"].shape[0], dec["up_w"].shape[1]
        upw = jnp.transpose(dec["up_w"], (2, 3, 0, 1)).reshape(4, ci, co)
        w1, gb1 = _prep_conv_bn(dec["conv1"], hs[lvl], ws[lvl])
        w2, gb2 = _prep_conv_bn(dec["conv2"], hs[lvl], ws[lvl])
        prep["decoders"].append({
            "S": _up_scatter(n, hs[lvl + 1], ws[lvl + 1]),
            "up_w": upw.astype(jnp.bfloat16),
            "up_b": dec["up_b"].reshape(1, co).astype(jnp.float32),
            "w1_skip": w1[:, :co, :],                 # cat([skip, up]) channel order
            "w1_up": w1[:, co:, :],
            "gb1": gb1,
            "w2": w2, "gb2": gb2,
        })
    n_cls, c0 = params["out_w"].shape[0], params["out_w"].shape[1]
    hw = jnp.transpose(params["out_w"], (2, 3, 1, 0)).reshape(9, c0, n_cls)
    prep["head"] = {"w": hw.astype(jnp.bfloat16),
                    "b": params["out_b"].reshape(1, n_cls).astype(jnp.float32)}
    return prep


# --------------------------------- forward ----------------------------------- #

def codeunet_forward(prep, x_nchw):
    """x_nchw: (N, Cin, H, W) f32.  Returns (N, n_classes, H, W) f32."""
    assert _ROLL_SIGN_CACHE, "call prepare_params() (outside jit) before the forward"
    n, cin, h, w = x_nchw.shape
    depth = len(prep["encoders"])
    n_stem = len(prep["stem"])
    n_code = len(prep["code"])
    n_dec = len(prep["decoders"])
    hs = [h >> i for i in range(depth + 1)]
    ws = [w >> i for i in range(depth + 1)]
    m0 = n * h * w
    n_cls = prep["head"]["w"].shape[-1]

    x2d = jnp.transpose(x_nchw, (0, 2, 3, 1)).reshape(m0, cin)

    # ---- flat operand list (order must match the unpack order in the kernel) ----
    args = [x2d]
    for wt, gb in prep["stem"]:
        args += [wt, gb]
    for e in prep["encoders"]:
        args += [e["G"]]
        for wt, gb in e["convs"]:
            args += [wt, gb]
    for wt, gb in prep["code"]:
        args += [wt, gb]
    for d in prep["decoders"]:
        args += [d["S"], d["up_w"], d["up_b"], d["w1_skip"], d["w1_up"],
                 d["gb1"], d["w2"], d["gb2"]]
    args += [prep["head"]["w"], prep["head"]["b"]]

    def kernel(*refs):
        it = iter(refs[:-1])
        out_ref = refs[-1]
        nxt = lambda: next(it)
        mc = _MaskCache()

        x_ref = nxt()
        cur = x_ref[...]

        # ---- stem: conv3x3+BN+ReLU x2 at full resolution ----
        for _ in range(n_stem):
            w_ref, gb_ref = nxt(), nxt()
            cur = _bn_relu(_conv3x3_acc([(cur, w_ref)], n, hs[0], ws[0], mc), gb_ref)
        skips = [cur]

        # ---- encoders: maxpool(2) (4 gather-matmuls + max) then double conv ----
        for i in range(depth):
            g_ref = nxt()
            xb = cur.astype(jnp.bfloat16)
            pooled = None
            for k in range(4):
                sel = jnp.dot(g_ref[k], xb, preferred_element_type=jnp.float32)
                pooled = sel if pooled is None else jnp.maximum(pooled, sel)
            cur = pooled
            for _ in range(2):
                w_ref, gb_ref = nxt(), nxt()
                cur = _bn_relu(
                    _conv3x3_acc([(cur, w_ref)], n, hs[i + 1], ws[i + 1], mc), gb_ref)
            skips.append(cur)

        # ---- code blocks at the bottleneck resolution ----
        for _ in range(n_code):
            w_ref, gb_ref = nxt(), nxt()
            cur = _bn_relu(
                _conv3x3_acc([(cur, w_ref)], n, hs[depth], ws[depth], mc), gb_ref)

        # ---- decoders: convtranspose(2,2) + concat (weight-split) + double conv ----
        for j in range(n_dec):
            lvl = depth - 1 - j
            s_ref, upw_ref, upb_ref = nxt(), nxt(), nxt()
            w1s_ref, w1u_ref, gb1_ref = nxt(), nxt(), nxt()
            w2_ref, gb2_ref = nxt(), nxt()

            xb = cur.astype(jnp.bfloat16)
            up = None
            for k in range(4):                       # sub-pixel scatter via 0/1 matmuls
                xw = jnp.dot(xb, upw_ref[k], preferred_element_type=jnp.float32)
                sc = jnp.dot(s_ref[k], xw.astype(jnp.bfloat16),
                             preferred_element_type=jnp.float32)
                up = sc if up is None else up + sc
            up = up + upb_ref[...]

            # The reference's F.pad is a no-op here: spatial sizes always match exactly.
            skip = skips[lvl]
            # conv over cat([skip, up], channel) == conv(skip, W_skip) + conv(up, W_up)
            cur = _bn_relu(
                _conv3x3_acc([(skip, w1s_ref), (up, w1u_ref)], n, hs[lvl], ws[lvl], mc),
                gb1_ref)
            cur = _bn_relu(
                _conv3x3_acc([(cur, w2_ref)], n, hs[lvl], ws[lvl], mc), gb2_ref)

        # ---- output head: plain 3x3 conv with bias (no BN / ReLU) ----
        hw_ref, hb_ref = nxt(), nxt()
        out_ref[...] = _conv3x3_acc([(cur, hw_ref)], n, hs[0], ws[0], mc) + hb_ref[...]

    out2d = pl.pallas_call(
        kernel,
        out_shape=jax.ShapeDtypeStruct((m0, n_cls), jnp.float32),
        in_specs=[_full_spec(a.shape) for a in args],
        out_specs=_full_spec((m0, n_cls)),
        compiler_params=pltpu.CompilerParams(vmem_limit_bytes=32 * 1024 * 1024),
    )(*args)

    return jnp.transpose(out2d.reshape(n, h, w, n_cls), (0, 3, 1, 2))


# ----------------------------------- main ------------------------------------ #

if __name__ == "__main__":
    key = jax.random.PRNGKey(0)
    kp, kx = jax.random.split(key)
    params = init_codeunet(kp, depth=4, code_size=2, n_classes=1, in_ch=3)

    # PyTorch-style NCHW input: (batch=2, channels=3, 16, 16)
    x_nchw = jax.random.normal(kx, (2, 3, 16, 16), jnp.float32)

    prep = prepare_params(params, 2, 16, 16)        # one-time weight re-layout
    fwd = jax.jit(codeunet_forward)
    y = fwd(prep, x_nchw)                           # (2, 1, 16, 16), like PyTorch
    jax.block_until_ready(y)

    assert y.shape == (2, 1, 16, 16)
    assert bool(jnp.all(jnp.isfinite(y)))
    print("KERNEL_OK")
</pallas_src>

<mosaic_0001>
module attributes {stable_mosaic.version = 11 : i64} {
  func.func @k(%arg0: memref<8x128xf32, #tpu.memory_space<vmem>>, %arg1: memref<8x128xf32, #tpu.memory_space<vmem>>) attributes {dimension_semantics = [], scalar_prefetch = 0 : i64, scratch_operands = 0 : i64, tpu.core_type = #tpu.core_type<tc>} {
    %c0 = arith.constant 0 : index
    %c0_0 = arith.constant 0 : index
    %0 = vector.load %arg0[%c0, %c0_0] : memref<8x128xf32, #tpu.memory_space<vmem>>, vector<8x128xf32>
    %c1_i32 = arith.constant 1 : i32
    %1 = tpu.dynamic_rotate %0 by %c1_i32 dim 0 : vector<8x128xf32>, i32 -> vector<8x128xf32>
    %c0_1 = arith.constant 0 : index
    %c0_2 = arith.constant 0 : index
    %2 = vector.load %arg1[%c0_1, %c0_2] : memref<8x128xf32, #tpu.memory_space<vmem>>, vector<8x128xf32>
    tpu.vector_store %arg1[%c0_1, %c0_2], %1 {strides = array<i32>} : memref<8x128xf32, #tpu.memory_space<vmem>>, vector<8x128xf32>,
    return
  }
}

</mosaic_0001>

<bundles_post_ra>
// kernel: tpu_custom_call.1
= control target key start
LH: loop header
LB: loop body
LE: loop exit
PB: predicated region body
PF: predicated region fallthrough
CT: control target
= control target key end

     0   :  { %6 = vsyncpa [#allocation3], 0  ;;  %s125_s0 = inlined_call_operand.hbm [shape: f32[8,128], index: 0, kind: input, shape index: {}]   ;;  %s126_s1 = inlined_call_operand.hbm [shape: f32[8,128], index: 1, kind: output, shape index: {}]  }
   0x1   :  { %7 = vsyncpa [#allocation4], 0  ;;  %s89_s6 = smov [#allocation2]   ;;  %s41_s10 = scalar_lea.hbm %s125_s0, 128 }
   0x2   :  { %s14_s7 = sshll.u32 %s89_s6, 4  ;;  %p42_p0 = scmp.ne.s32.totalorder %s125_s0, %s41_s10  ;;  %s15_s7 = int_to_ptr.vmem [resolvable:$true] %s14_s7 }
   0x3   :  { %p45_p1 = scmp.lt.u32.totalorder %s41_s10, %s125_s0 }
   0x5   :  { %p47_p2 = pnand %p45_p1, %p42_p0 }
   0x7   :  { %50 = shalt.err (!%p47_p2)
}
   0x8   :  { %s51_s15 = scalar_lea.vmem %s15_s7, 128  ;;  %p56_p4 = scmp.lt.s32.totalorder %s15_s7, %s15_s7 }
   0x9   :  { %p52_p3 = scmp.ne.s32.totalorder %s15_s7, %s51_s15  ;;  %p57_p5 = scmp.lt.s32.totalorder %s51_s15, %s51_s15 }
   0xb   :  { %p58_p6 = por %p57_p5, %p56_p4 }
   0xd   :  { %p59_p7 = pnand %p58_p6, %p52_p3 }
   0xf   :  { %62 = shalt.err (!%p59_p7)
}
  0x10   :  { %17 = dma.hbm_to_vmem [thread:$0]  %s125_s0, 128, %s15_s7, [#allocation3]  }
  0x11   :  { %85 = dma.done.wait [#allocation3], 128  }
  0x12   :  { %86 = vsyncadd [#allocation3], 4294967168  ;;  %s90_s18 = smov [#allocation5]   ;;  %v21_v0 = vld [vmem:[#allocation2] sm:$0xff] }
  0x13   :  { %s30_s19 = sshll.u32 %s90_s18, 4  ;;  %v22_v1 = vrot.slane %v21_v0, 7  ;;  %s31_s19 = int_to_ptr.vmem [resolvable:$true] %s30_s19 }
  0x14   :  { %s63_s20 = scalar_lea.vmem %s31_s19, 128  ;;  %p68_p9 = scmp.lt.s32.totalorder %s31_s19, %s31_s19 }
  0x15   :  { %23 = vst [vmem:[#allocation5] sm:$0xff] %v22_v1  ;;  %p64_p8 = scmp.ne.s32.totalorder %s31_s19, %s63_s20  ;;  %p69_p10 = scmp.lt.s32.totalorder %s63_s20, %s63_s20 }
  0x17   :  { %p70_p11 = por %p69_p10, %p68_p9 }
  0x19   :  { %p71_p12 = pnand %p70_p11, %p64_p8 }
  0x1b   :  { %74 = shalt.err (!%p71_p12)
}
  0x1c   :  { %s75_s23 = scalar_lea.hbm %s126_s1, 128 }
  0x1d   :  { %p76_p13 = scmp.ne.s32.totalorder %s126_s1, %s75_s23  ;;  %p79_p0 = scmp.lt.u32.totalorder %s75_s23, %s126_s1 }
  0x1f   :  { %p81_p1 = pnand %p79_p0, %p76_p13 }
  0x21   :  { %84 = shalt.err (!%p81_p1)
}
  0x22   :  { %33 = dma.vmem_to_hbm [thread:$0]  %s31_s19, 128, %s126_s1, [#allocation4]  }
  0x23   :  { %87 = dma.done.wait [#allocation4], 128  }
  0x24   :  { %88 = vsyncadd [#allocation4], 4294967168 }
  0x25   :  { %37 = vsyncpa [#allocation3], 1 }
  0x26   :  { %38 = vsyncpa [#allocation4], 1 }

</bundles_post_ra>
